<compile_context>
chip_gen: v7x
topology: tpu7x:2x2x1
jax: 0.10.0
libtpu: 0.0.40
codegen_flags: <defaults>
</compile_context>

<pallas_src>
import jax
import jax.numpy as jnp
from jax.experimental import pallas as pl
from jax.experimental.pallas import tpu as pltpu


# ----------------------------------------------------------------------------
# Single fused kernel.
# ----------------------------------------------------------------------------
def _fused_rgcn_kernel(adj_ref, x_ref, pool_ref,
                       w1_ref, w2_ref, w3_ref, wlin_ref, bias_ref,
                       o_ref):
    f32 = jnp.float32
    N = adj_ref.shape[0]
    RN = adj_ref.shape[1]
    R = RN // N
    Hc = wlin_ref.shape[0]
    NC = o_ref.shape[1]

    adj = adj_ref[...]                    # (N, R*N) lane-concat, mean-normalized
    mask = adj > 0.0                      # edge mask for RGAT (1/deg > 0 on edges)

    b1 = bias_ref[0:1, :]
    b2 = bias_ref[1:2, :]
    b3 = bias_ref[2:3, :]
    blin = bias_ref[3:4, :NC]

    # ---- RGCNConv (aggr='mean') with BN folded into W/b and ReLU epilogue ----
    def rgcn_layer(h, w_ref, b_row):
        # ONE matmul against [W_root | W_1 | ... | W_R]  -> (N, (R+1)*Hc)
        hw = jnp.dot(h, w_ref[...], preferred_element_type=f32)
        out = hw[:, :Hc] + b_row
        # relayout relation part (N, R*Hc) -> (R*N, Hc); sum over relations then
        # falls out of one (N, R*N) @ (R*N, Hc) contraction.
        stacked = jnp.concatenate(
            [hw[:, (r + 1) * Hc:(r + 2) * Hc] for r in range(R)], axis=0)
        out = out + jnp.dot(adj, stacked, preferred_element_type=f32)
        return jnp.maximum(out, 0.0)      # folded BN + ReLU

    h = rgcn_layer(x_ref[...], w1_ref, b1)
    h = rgcn_layer(h, w2_ref, b2)

    # ---- RGATConv (heads=1, dim=1), one-shot softmax across all relations ----
    # ONE matmul: [W_1*s | ... | W_R*s | wq_1..wq_R | wk_1..wk_R]
    hvqk = jnp.dot(h, w3_ref[...], preferred_element_type=f32)      # (N, R*Hc+2R)
    vstacked = jnp.concatenate(
        [hvqk[:, r * Hc:(r + 1) * Hc] for r in range(R)], axis=0)   # (R*N, Hc)
    qk = hvqk[:, R * Hc:]                                           # (N, 2R)

    z_blocks = []
    for r in range(R):
        k_row = jnp.transpose(qk[:, R + r:R + r + 1])               # (1, N)
        z_blocks.append(qk[:, r:r + 1] + k_row)                     # (N, N)
    z = jnp.concatenate(z_blocks, axis=1)                           # (N, R*N)
    z = jnp.where(z > 0.0, z, 0.2 * z)                              # leaky_relu
    zm = jnp.where(mask, z, -1e30)
    m = jnp.max(zm, axis=-1, keepdims=True)
    p = jnp.where(mask, jnp.exp(zm - m), 0.0)
    l = jnp.sum(p, axis=-1, keepdims=True)
    pv = jnp.dot(p, vstacked, preferred_element_type=f32)           # (N, Hc)
    inv_l = pl.reciprocal(jnp.maximum(l, 1e-30), approx=True)
    att = jnp.where(l > 0.0, pv * inv_l, 0.0)   # isolated nodes: bias only
    h3 = jnp.maximum(att + b3, 0.0)             # folded BN(bias) + ReLU

    # ---- global_mean_pool + Linear -------------------------------------------
    pooled = jnp.dot(pool_ref[...], h3, preferred_element_type=f32)
    o_ref[...] = jnp.dot(pooled, wlin_ref[...],
                         preferred_element_type=f32) + blin


def rgcn_forward(params, x, adj_i8, inv_deg, pool_mat):
    """Inference forward. adj_i8: [R,N,N] binary mask; inv_deg: [R,N,1] f32."""
    p = params
    eps = 1e-5
    N, F = x.shape
    R = adj_i8.shape[0]
    Hc = p["w_root1"].shape[1]
    G = pool_mat.shape[0]
    NC = p["w_lin"].shape[1]
    assert NC <= Hc, "bias packing assumes num_classes <= hidden_channels"

    # ---- pre-normalized, lane-concatenated adjacency: (N, R*N) ---------------
    adj_norm = adj_i8.astype(jnp.float32) * inv_deg                 # (R, N, N)
    adj_cat = jnp.transpose(adj_norm, (1, 0, 2)).reshape(N, R * N)

    # ---- fold eval-mode BatchNorm into conv weights / biases (wrapper, free) --
    def fold(w_rel, w_root, b, g, be, mu, var):
        s = g * jax.lax.rsqrt(var + eps)            # (1, H)
        t = be - mu * s
        return w_rel * s, w_root * s, b * s + t

    w_rel1f, w_root1f, b1f = fold(p["w_rel1"], p["w_root1"], p["b1"],
                                  p["g1"], p["be1"], p["mu1"], p["var1"])
    w_rel2f, w_root2f, b2f = fold(p["w_rel2"], p["w_root2"], p["b2"],
                                  p["g2"], p["be2"], p["mu2"], p["var2"])

    def lane_cat(w_root, w_rel):                    # -> (Fin, (R+1)*Hc)
        fin = w_root.shape[0]
        return jnp.concatenate(
            [w_root, jnp.transpose(w_rel, (1, 0, 2)).reshape(fin, R * Hc)],
            axis=1)

    w1_cat = lane_cat(w_root1f, w_rel1f)            # (F, (R+1)*Hc)
    w2_cat = lane_cat(w_root2f, w_rel2f)            # (Hc, (R+1)*Hc)

    # RGAT: BN scale folded into the value projection only (attention logits use
    # the unscaled transform); value / q / k weights lane-concatenated.
    s3 = p["g3"] * jax.lax.rsqrt(p["var3"] + eps)   # (1, Hc)
    t3 = p["be3"] - p["mu3"] * s3
    w_rel3v = p["w_rel3"] * s3                      # (R, Hc, Hc) value path
    wq3 = jnp.einsum("rch,h->rc", p["w_rel3"], p["q3"][0])   # (R, Hc) unscaled
    wk3 = jnp.einsum("rch,h->rc", p["w_rel3"], p["k3"][0])   # (R, Hc) unscaled
    w3_cat = jnp.concatenate(
        [jnp.transpose(w_rel3v, (1, 0, 2)).reshape(Hc, R * Hc),
         jnp.transpose(wq3), jnp.transpose(wk3)], axis=1)    # (Hc, R*Hc + 2R)
    b3f = p["b3"] * s3 + t3

    # ---- packed biases: rows = [b1', b2', b3', b_lin (padded to Hc)] ----------
    blin_pad = jnp.pad(p["b_lin"], ((0, 0), (0, Hc - NC)))
    biases = jnp.concatenate([b1f, b2f, b3f, blin_pad], axis=0)     # (4, Hc)

    vspec = pl.BlockSpec(memory_space=pltpu.MemorySpace.VMEM)
    return pl.pallas_call(
        _fused_rgcn_kernel,
        out_shape=jax.ShapeDtypeStruct((G, NC), jnp.float32),
        in_specs=[vspec] * 8,
        out_specs=vspec,
    )(adj_cat, x, pool_mat, w1_cat, w2_cat, w3_cat, p["w_lin"], biases)


# ----------------------------------------------------------------------------
# Pure-JAX reference (un-folded BN, explicit softmax) for a correctness check.
# ----------------------------------------------------------------------------
def _reference_forward(params, x, adj_i8, inv_deg, pool_mat):
    p = params
    eps = 1e-5
    adj = adj_i8.astype(jnp.float32)                # (R, N, N)
    adj_norm = adj * inv_deg
    R, N, _ = adj.shape

    def bn(h, g, be, mu, var):
        return (h - mu) * jax.lax.rsqrt(var + eps) * g + be

    def rgcn(h, wrel, wroot, b):
        return h @ wroot + b + jnp.einsum("rij,jc,rch->ih", adj_norm, h, wrel)

    h = jax.nn.relu(bn(rgcn(x, p["w_rel1"], p["w_root1"], p["b1"]),
                       p["g1"], p["be1"], p["mu1"], p["var1"]))
    h = jax.nn.relu(bn(rgcn(h, p["w_rel2"], p["w_root2"], p["b2"]),
                       p["g2"], p["be2"], p["mu2"], p["var2"]))

    hr = jnp.einsum("ic,rch->rih", h, p["w_rel3"])  # (R, N, Hc)
    q = jnp.einsum("rih,h->ri", hr, p["q3"][0])
    k = jnp.einsum("rjh,h->rj", hr, p["k3"][0])
    z = q[:, :, None] + k[:, None, :]
    z = jnp.where(z > 0, z, 0.2 * z)
    zm = jnp.where(adj > 0.5, z, -jnp.inf)
    zf = jnp.transpose(zm, (1, 0, 2)).reshape(N, R * N)
    mmax = jnp.max(zf, axis=-1, keepdims=True)
    mmax = jnp.where(jnp.isfinite(mmax), mmax, 0.0)
    pex = jnp.where(jnp.isfinite(zf), jnp.exp(zf - mmax), 0.0)
    den = pex.sum(-1, keepdims=True)
    alpha = jnp.where(den > 0, pex / jnp.maximum(den, 1e-30), 0.0)
    att = alpha @ hr.reshape(R * N, -1) + p["b3"]
    h3 = jax.nn.relu(bn(att, p["g3"], p["be3"], p["mu3"], p["var3"]))
    return pool_mat @ h3 @ p["w_lin"] + p["b_lin"]


def _glorot(key, shape):
    fan_in, fan_out = shape[-2], shape[-1]
    s = (6.0 / (fan_in + fan_out)) ** 0.5
    return jax.random.uniform(key, shape, jnp.float32, -s, s)


if __name__ == "__main__":
    # Small shapes consistent with the module's forward.
    N = 16          # total nodes in the batched graph
    F = 8           # num_node_features
    Hc = 32         # hidden_channels
    R = 3           # num_relations
    NC = 4          # num_classes
    G = 2           # graphs in the batch

    key = jax.random.PRNGKey(0)
    keys = jax.random.split(key, 24)

    x = jax.random.normal(keys[0], (N, F), jnp.float32)
    batch = jnp.concatenate(
        [jnp.zeros(N // 2, jnp.int32), jnp.ones(N - N // 2, jnp.int32)])

    # per-relation binary adjacency (restricted within each graph)
    same_graph = batch[:, None] == batch[None, :]
    adj_bool = (jax.random.uniform(keys[1], (R, N, N)) < 0.25) & same_graph[None]
    adj_i8 = adj_bool.astype(jnp.int8)
    deg = adj_bool.astype(jnp.float32).sum(axis=-1, keepdims=True)   # (R, N, 1)
    inv_deg = 1.0 / jnp.maximum(deg, 1.0)

    # global_mean_pool matrix
    onehot = (batch[None, :] == jnp.arange(G)[:, None]).astype(jnp.float32)
    pool_mat = onehot / jnp.maximum(onehot.sum(axis=-1, keepdims=True), 1.0)

    params = {
        # RGCNConv 1
        "w_rel1": _glorot(keys[2], (R, F, Hc)),
        "w_root1": _glorot(keys[3], (F, Hc)),
        "b1": 0.01 * jax.random.normal(keys[4], (1, Hc), jnp.float32),
        # BatchNorm 1 (running stats)
        "g1": 1.0 + 0.1 * jax.random.normal(keys[5], (1, Hc), jnp.float32),
        "be1": 0.1 * jax.random.normal(keys[6], (1, Hc), jnp.float32),
        "mu1": 0.1 * jax.random.normal(keys[7], (1, Hc), jnp.float32),
        "var1": 1.0 + 0.1 * jax.random.uniform(keys[8], (1, Hc), jnp.float32),
        # RGCNConv 2
        "w_rel2": _glorot(keys[9], (R, Hc, Hc)),
        "w_root2": _glorot(keys[10], (Hc, Hc)),
        "b2": 0.01 * jax.random.normal(keys[11], (1, Hc), jnp.float32),
        # BatchNorm 2
        "g2": 1.0 + 0.1 * jax.random.normal(keys[12], (1, Hc), jnp.float32),
        "be2": 0.1 * jax.random.normal(keys[13], (1, Hc), jnp.float32),
        "mu2": 0.1 * jax.random.normal(keys[14], (1, Hc), jnp.float32),
        "var2": 1.0 + 0.1 * jax.random.uniform(keys[15], (1, Hc), jnp.float32),
        # RGATConv (heads=1, dim=1)
        "w_rel3": _glorot(keys[16], (R, Hc, Hc)),
        "q3": _glorot(keys[17], (1, Hc)),
        "k3": _glorot(keys[18], (1, Hc)),
        "b3": 0.01 * jax.random.normal(keys[19], (1, Hc), jnp.float32),
        # BatchNorm 3
        "g3": 1.0 + 0.1 * jax.random.normal(keys[20], (1, Hc), jnp.float32),
        "be3": 0.1 * jax.random.normal(keys[21], (1, Hc), jnp.float32),
        "mu3": 0.1 * jax.random.normal(keys[22], (1, Hc), jnp.float32),
        "var3": jnp.ones((1, Hc), jnp.float32),
        # final Linear
        "w_lin": _glorot(keys[23], (Hc, NC)),
        "b_lin": jnp.zeros((1, NC), jnp.float32),
    }

    out = rgcn_forward(params, x, adj_i8, inv_deg, pool_mat)
    out = jax.block_until_ready(out)
    assert out.shape == (G, NC) and out.dtype == jnp.float32
    assert bool(jnp.all(jnp.isfinite(out)))

    ref = _reference_forward(params, x, adj_i8, inv_deg, pool_mat)
    assert bool(jnp.allclose(out, ref, atol=2e-2, rtol=2e-2)), (
        f"mismatch: max abs diff {jnp.max(jnp.abs(out - ref))}")

    print("KERNEL_OK")
</pallas_src>

<mosaic_0001>
module attributes {stable_mosaic.version = 11 : i64} {
  func.func @_fused_rgcn_kernel(%arg0: memref<16x48xf32, #tpu.memory_space<vmem>>, %arg1: memref<16x8xf32, #tpu.memory_space<vmem>>, %arg2: memref<2x16xf32, #tpu.memory_space<vmem>>, %arg3: memref<8x128xf32, #tpu.memory_space<vmem>>, %arg4: memref<32x128xf32, #tpu.memory_space<vmem>>, %arg5: memref<32x102xf32, #tpu.memory_space<vmem>>, %arg6: memref<32x4xf32, #tpu.memory_space<vmem>>, %arg7: memref<4x32xf32, #tpu.memory_space<vmem>>, %arg8: memref<2x4xf32, #tpu.memory_space<vmem>>) attributes {dimension_semantics = [], scalar_prefetch = 0 : i64, scratch_operands = 0 : i64, tpu.core_type = #tpu.core_type<tc>} {
    %c0 = arith.constant 0 : index
    %c0_0 = arith.constant 0 : index
    %0 = vector.load %arg0[%c0, %c0_0] : memref<16x48xf32, #tpu.memory_space<vmem>>, vector<16x48xf32>
    %cst = arith.constant 0.000000e+00 : f32
    %1 = vector.broadcast %cst : f32 to vector<16x48xf32>
    %2 = arith.cmpf ogt, %0, %1 : vector<16x48xf32>
    %c0_1 = arith.constant 0 : index
    %c0_2 = arith.constant 0 : index
    %3 = vector.load %arg7[%c0_1, %c0_2] : memref<4x32xf32, #tpu.memory_space<vmem>>, vector<1x32xf32>
    %c1 = arith.constant 1 : index
    %c0_3 = arith.constant 0 : index
    %4 = vector.load %arg7[%c1, %c0_3] : memref<4x32xf32, #tpu.memory_space<vmem>>, vector<1x32xf32>
    %c2 = arith.constant 2 : index
    %c0_4 = arith.constant 0 : index
    %5 = vector.load %arg7[%c2, %c0_4] : memref<4x32xf32, #tpu.memory_space<vmem>>, vector<1x32xf32>
    %c3 = arith.constant 3 : index
    %c0_5 = arith.constant 0 : index
    %6 = vector.load %arg7[%c3, %c0_5] : memref<4x32xf32, #tpu.memory_space<vmem>>, vector<1x4xf32>
    %c0_6 = arith.constant 0 : index
    %c0_7 = arith.constant 0 : index
    %7 = vector.load %arg1[%c0_6, %c0_7] : memref<16x8xf32, #tpu.memory_space<vmem>>, vector<16x8xf32>
    %c0_8 = arith.constant 0 : index
    %c0_9 = arith.constant 0 : index
    %8 = vector.load %arg3[%c0_8, %c0_9] : memref<8x128xf32, #tpu.memory_space<vmem>>, vector<8x128xf32>
    %cst_10 = arith.constant dense<0.000000e+00> : vector<16x128xf32>
    %9 = tpu.matmul %7, %8, %cst_10 {dimension_numbers = #tpu.dot_dimension_numbers<[1], [0], [0], [1], [0, 0, 1, 1], [], []>} : vector<16x8xf32>, vector<8x128xf32>, vector<16x128xf32> -> vector<16x128xf32>
    %10 = vector.extract_strided_slice %9 {offsets = [0, 0], sizes = [16, 32], strides = [1, 1]} : vector<16x128xf32> to vector<16x32xf32>
    %11 = vector.broadcast %3 : vector<1x32xf32> to vector<16x32xf32>
    %12 = arith.addf %10, %11 : vector<16x32xf32>
    %13 = vector.extract_strided_slice %9 {offsets = [0, 32], sizes = [16, 32], strides = [1, 1]} : vector<16x128xf32> to vector<16x32xf32>
    %14 = vector.extract_strided_slice %9 {offsets = [0, 64], sizes = [16, 32], strides = [1, 1]} : vector<16x128xf32> to vector<16x32xf32>
    %15 = vector.extract_strided_slice %9 {offsets = [0, 96], sizes = [16, 32], strides = [1, 1]} : vector<16x128xf32> to vector<16x32xf32>
    %16 = tpu.concatenate %13, %14, %15 in 0 : vector<16x32xf32>, vector<16x32xf32>, vector<16x32xf32> -> vector<48x32xf32>
    %cst_11 = arith.constant dense<0.000000e+00> : vector<16x32xf32>
    %17 = tpu.matmul %0, %16, %cst_11 {dimension_numbers = #tpu.dot_dimension_numbers<[1], [0], [0], [1], [0, 0, 1, 1], [], []>} : vector<16x48xf32>, vector<48x32xf32>, vector<16x32xf32> -> vector<16x32xf32>
    %18 = arith.addf %12, %17 : vector<16x32xf32>
    %cst_12 = arith.constant 0.000000e+00 : f32
    %19 = vector.broadcast %cst_12 : f32 to vector<16x32xf32>
    %20 = arith.maximumf %18, %19 : vector<16x32xf32>
    %c0_13 = arith.constant 0 : index
    %c0_14 = arith.constant 0 : index
    %21 = vector.load %arg4[%c0_13, %c0_14] : memref<32x128xf32, #tpu.memory_space<vmem>>, vector<32x128xf32>
    %cst_15 = arith.constant dense<0.000000e+00> : vector<16x128xf32>
    %22 = tpu.matmul %20, %21, %cst_15 {dimension_numbers = #tpu.dot_dimension_numbers<[1], [0], [0], [1], [0, 0, 1, 1], [], []>} : vector<16x32xf32>, vector<32x128xf32>, vector<16x128xf32> -> vector<16x128xf32>
    %23 = vector.extract_strided_slice %22 {offsets = [0, 0], sizes = [16, 32], strides = [1, 1]} : vector<16x128xf32> to vector<16x32xf32>
    %24 = vector.broadcast %4 : vector<1x32xf32> to vector<16x32xf32>
    %25 = arith.addf %23, %24 : vector<16x32xf32>
    %26 = vector.extract_strided_slice %22 {offsets = [0, 32], sizes = [16, 32], strides = [1, 1]} : vector<16x128xf32> to vector<16x32xf32>
    %27 = vector.extract_strided_slice %22 {offsets = [0, 64], sizes = [16, 32], strides = [1, 1]} : vector<16x128xf32> to vector<16x32xf32>
    %28 = vector.extract_strided_slice %22 {offsets = [0, 96], sizes = [16, 32], strides = [1, 1]} : vector<16x128xf32> to vector<16x32xf32>
    %29 = tpu.concatenate %26, %27, %28 in 0 : vector<16x32xf32>, vector<16x32xf32>, vector<16x32xf32> -> vector<48x32xf32>
    %cst_16 = arith.constant dense<0.000000e+00> : vector<16x32xf32>
    %30 = tpu.matmul %0, %29, %cst_16 {dimension_numbers = #tpu.dot_dimension_numbers<[1], [0], [0], [1], [0, 0, 1, 1], [], []>} : vector<16x48xf32>, vector<48x32xf32>, vector<16x32xf32> -> vector<16x32xf32>
    %31 = arith.addf %25, %30 : vector<16x32xf32>
    %cst_17 = arith.constant 0.000000e+00 : f32
    %32 = vector.broadcast %cst_17 : f32 to vector<16x32xf32>
    %33 = arith.maximumf %31, %32 : vector<16x32xf32>
    %c0_18 = arith.constant 0 : index
    %c0_19 = arith.constant 0 : index
    %34 = vector.load %arg5[%c0_18, %c0_19] : memref<32x102xf32, #tpu.memory_space<vmem>>, vector<32x102xf32>
    %cst_20 = arith.constant dense<0.000000e+00> : vector<16x102xf32>
    %35 = tpu.matmul %33, %34, %cst_20 {dimension_numbers = #tpu.dot_dimension_numbers<[1], [0], [0], [1], [0, 0, 1, 1], [], []>} : vector<16x32xf32>, vector<32x102xf32>, vector<16x102xf32> -> vector<16x102xf32>
    %36 = vector.extract_strided_slice %35 {offsets = [0, 0], sizes = [16, 32], strides = [1, 1]} : vector<16x102xf32> to vector<16x32xf32>
    %37 = vector.extract_strided_slice %35 {offsets = [0, 32], sizes = [16, 32], strides = [1, 1]} : vector<16x102xf32> to vector<16x32xf32>
    %38 = vector.extract_strided_slice %35 {offsets = [0, 64], sizes = [16, 32], strides = [1, 1]} : vector<16x102xf32> to vector<16x32xf32>
    %39 = tpu.concatenate %36, %37, %38 in 0 : vector<16x32xf32>, vector<16x32xf32>, vector<16x32xf32> -> vector<48x32xf32>
    %40 = vector.extract_strided_slice %35 {offsets = [0, 96], sizes = [16, 6], strides = [1, 1]} : vector<16x102xf32> to vector<16x6xf32>
    %41 = vector.extract_strided_slice %40 {offsets = [0, 3], sizes = [16, 1], strides = [1, 1]} : vector<16x6xf32> to vector<16x1xf32>
    %42 = tpu.transpose %41, [1, 0] : vector<16x1xf32> -> vector<1x16xf32>
    %43 = vector.extract_strided_slice %40 {offsets = [0, 0], sizes = [16, 1], strides = [1, 1]} : vector<16x6xf32> to vector<16x1xf32>
    %44 = vector.broadcast %43 : vector<16x1xf32> to vector<16x16xf32>
    %45 = vector.broadcast %42 : vector<1x16xf32> to vector<16x16xf32>
    %46 = arith.addf %44, %45 : vector<16x16xf32>
    %47 = vector.extract_strided_slice %40 {offsets = [0, 4], sizes = [16, 1], strides = [1, 1]} : vector<16x6xf32> to vector<16x1xf32>
    %48 = tpu.transpose %47, [1, 0] : vector<16x1xf32> -> vector<1x16xf32>
    %49 = vector.extract_strided_slice %40 {offsets = [0, 1], sizes = [16, 1], strides = [1, 1]} : vector<16x6xf32> to vector<16x1xf32>
    %50 = vector.broadcast %49 : vector<16x1xf32> to vector<16x16xf32>
    %51 = vector.broadcast %48 : vector<1x16xf32> to vector<16x16xf32>
    %52 = arith.addf %50, %51 : vector<16x16xf32>
    %53 = vector.extract_strided_slice %40 {offsets = [0, 5], sizes = [16, 1], strides = [1, 1]} : vector<16x6xf32> to vector<16x1xf32>
    %54 = tpu.transpose %53, [1, 0] : vector<16x1xf32> -> vector<1x16xf32>
    %55 = vector.extract_strided_slice %40 {offsets = [0, 2], sizes = [16, 1], strides = [1, 1]} : vector<16x6xf32> to vector<16x1xf32>
    %56 = vector.broadcast %55 : vector<16x1xf32> to vector<16x16xf32>
    %57 = vector.broadcast %54 : vector<1x16xf32> to vector<16x16xf32>
    %58 = arith.addf %56, %57 : vector<16x16xf32>
    %59 = tpu.concatenate %46, %52, %58 in 1 : vector<16x16xf32>, vector<16x16xf32>, vector<16x16xf32> -> vector<16x48xf32>
    %cst_21 = arith.constant 0.000000e+00 : f32
    %60 = vector.broadcast %cst_21 : f32 to vector<16x48xf32>
    %61 = arith.cmpf ogt, %59, %60 : vector<16x48xf32>
    %cst_22 = arith.constant 2.000000e-01 : f32
    %62 = vector.broadcast %cst_22 : f32 to vector<16x48xf32>
    %63 = arith.mulf %62, %59 : vector<16x48xf32>
    %64 = arith.select %61, %59, %63 : vector<16x48xi1>, vector<16x48xf32>
    %cst_23 = arith.constant -1.000000e+30 : f32
    %65 = vector.broadcast %cst_23 : f32 to vector<16x48xf32>
    %66 = arith.select %2, %64, %65 : vector<16x48xi1>, vector<16x48xf32>
    %cst_24 = arith.constant dense<0xFF800000> : vector<16xf32>
    %67 = vector.multi_reduction <maximumf>, %66, %cst_24 [1] : vector<16x48xf32> to vector<16xf32>
    %68 = vector.shape_cast %67 : vector<16xf32> to vector<16x1xf32>
    %69 = vector.broadcast %68 : vector<16x1xf32> to vector<16x48xf32>
    %70 = arith.subf %66, %69 : vector<16x48xf32>
    %71 = math.exp %70 : vector<16x48xf32>
    %cst_25 = arith.constant 0.000000e+00 : f32
    %72 = vector.broadcast %cst_25 : f32 to vector<16x48xf32>
    %73 = arith.select %2, %71, %72 : vector<16x48xi1>, vector<16x48xf32>
    %cst_26 = arith.constant dense<0.000000e+00> : vector<16xf32>
    %74 = vector.multi_reduction <add>, %73, %cst_26 [1] : vector<16x48xf32> to vector<16xf32>
    %75 = vector.shape_cast %74 : vector<16xf32> to vector<16x1xf32>
    %cst_27 = arith.constant dense<0.000000e+00> : vector<16x32xf32>
    %76 = tpu.matmul %73, %39, %cst_27 {dimension_numbers = #tpu.dot_dimension_numbers<[1], [0], [0], [1], [0, 0, 1, 1], [], []>} : vector<16x48xf32>, vector<48x32xf32>, vector<16x32xf32> -> vector<16x32xf32>
    %cst_28 = arith.constant 1.000000e-30 : f32
    %77 = vector.broadcast %cst_28 : f32 to vector<16x1xf32>
    %78 = arith.maximumf %75, %77 : vector<16x1xf32>
    %79 = tpu.reciprocal %78 {approx = true} : vector<16x1xf32> -> vector<16x1xf32>
    %cst_29 = arith.constant 0.000000e+00 : f32
    %80 = vector.broadcast %cst_29 : f32 to vector<16x1xf32>
    %81 = arith.cmpf ogt, %75, %80 : vector<16x1xf32>
    %82 = vector.broadcast %79 : vector<16x1xf32> to vector<16x32xf32>
    %83 = arith.mulf %76, %82 : vector<16x32xf32>
    %cst_30 = arith.constant 0.000000e+00 : f32
    %84 = vector.shape_cast %81 : vector<16x1xi1> to vector<16x1xi1>
    %85 = vector.broadcast %84 : vector<16x1xi1> to vector<16x32xi1>
    %86 = vector.broadcast %cst_30 : f32 to vector<16x32xf32>
    %87 = arith.select %85, %83, %86 : vector<16x32xi1>, vector<16x32xf32>
    %88 = vector.broadcast %5 : vector<1x32xf32> to vector<16x32xf32>
    %89 = arith.addf %87, %88 : vector<16x32xf32>
    %cst_31 = arith.constant 0.000000e+00 : f32
    %90 = vector.broadcast %cst_31 : f32 to vector<16x32xf32>
    %91 = arith.maximumf %89, %90 : vector<16x32xf32>
    %c0_32 = arith.constant 0 : index
    %c0_33 = arith.constant 0 : index
    %92 = vector.load %arg2[%c0_32, %c0_33] : memref<2x16xf32, #tpu.memory_space<vmem>>, vector<2x16xf32>
    %cst_34 = arith.constant dense<0.000000e+00> : vector<2x32xf32>
    %93 = tpu.matmul %92, %91, %cst_34 {dimension_numbers = #tpu.dot_dimension_numbers<[1], [0], [0], [1], [0, 0, 1, 1], [], []>} : vector<2x16xf32>, vector<16x32xf32>, vector<2x32xf32> -> vector<2x32xf32>
    %c0_35 = arith.constant 0 : index
    %c0_36 = arith.constant 0 : index
    %94 = vector.load %arg6[%c0_35, %c0_36] : memref<32x4xf32, #tpu.memory_space<vmem>>, vector<32x4xf32>
    %cst_37 = arith.constant dense<0.000000e+00> : vector<2x4xf32>
    %95 = tpu.matmul %93, %94, %cst_37 {dimension_numbers = #tpu.dot_dimension_numbers<[1], [0], [0], [1], [0, 0, 1, 1], [], []>} : vector<2x32xf32>, vector<32x4xf32>, vector<2x4xf32> -> vector<2x4xf32>
    %96 = vector.broadcast %6 : vector<1x4xf32> to vector<2x4xf32>
    %97 = arith.addf %95, %96 : vector<2x4xf32>
    %c0_38 = arith.constant 0 : index
    %c0_39 = arith.constant 0 : index
    %98 = vector.load %arg8[%c0_38, %c0_39] : memref<2x4xf32, #tpu.memory_space<vmem>>, vector<2x4xf32>
    tpu.vector_store %arg8[%c0_38, %c0_39], %97 {strides = array<i32>} : memref<2x4xf32, #tpu.memory_space<vmem>>, vector<2x4xf32>,
    return
  }
}

</mosaic_0001>

<bundles_post_ra>
// kernel: tpu_custom_call.1
= control target key start
LH: loop header
LB: loop body
LE: loop exit
PB: predicated region body
PF: predicated region fallthrough
CT: control target
= control target key end

     0   :  { %13 = vsyncpa [#allocation3], 0  ;;  %s1624_s0 = inlined_call_operand.hbm [shape: f32[16,48], index: 0, kind: input, shape index: {}]   ;;  %s1625_s1 = inlined_call_operand.vmem [shape: f32[16,8], index: 1, kind: input, shape index: {}]   ;;  %s1626_s2 = inlined_call_operand.vmem [shape: f32[2,16], index: 2, kind: input, shape index: {}]   ;;  %s1627_s3 = inlined_call_operand.hbm [shape: f32[8,128], index: 3, kind: input, shape index: {}]   ;;  %s1628_s4 = inlined_call_operand.vmem [shape: f32[32,128], index: 4, kind: input, shape index: {}]   ;;  %s1629_s5 = inlined_call_operand.vmem [shape: f32[32,102], index: 5, kind: input, shape index: {}]   ;;  %s1630_s6 = inlined_call_operand.vmem [shape: f32[32,4], index: 6, kind: input, shape index: {}]   ;;  %s1631_s7 = inlined_call_operand.vmem [shape: f32[4,32], index: 7, kind: input, shape index: {}]   ;;  %s1632_s8 = inlined_call_operand.hbm [shape: f32[2,4], index: 8, kind: output, shape index: {}]  }
   0x1   :  { %14 = vsyncpa [#allocation6], 0 }
   0x2   :  { %15 = vsyncpa [#allocation4], 0  ;;  %s1411_s27 = smov [#allocation2]   ;;  %s1339_s9 = scalar_lea.hbm %s1624_s0, 256 }
   0x3   :  { %s21_s28 = sshll.u32 %s1411_s27, 4  ;;  %p1340_p0 = scmp.ne.s32.totalorder %s1624_s0, %s1339_s9  ;;  %s22_s28 = int_to_ptr.vmem [resolvable:$true] %s21_s28 }
   0x4   :  { %p1343_p1 = scmp.lt.u32.totalorder %s1339_s9, %s1624_s0 }
   0x6   :  { %p1345_p2 = pnand %p1343_p1, %p1340_p0 }
   0x8   :  { %1348 = shalt.err (!%p1345_p2)
}
   0x9   :  { %s1349_s14 = scalar_lea.vmem %s22_s28, 256  ;;  %p1354_p4 = scmp.lt.s32.totalorder %s22_s28, %s22_s28 }
   0xa   :  { %p1350_p3 = scmp.ne.s32.totalorder %s22_s28, %s1349_s14  ;;  %p1355_p5 = scmp.lt.s32.totalorder %s1349_s14, %s1349_s14 }
   0xc   :  { %p1356_p6 = por %p1355_p5, %p1354_p4 }
   0xe   :  { %p1357_p7 = pnand %p1356_p6, %p1350_p3 }
  0x10   :  { %1360 = shalt.err (!%p1357_p7)
}
  0x11   :  { %s1412_s15 = smov 128   ;;  %s1413_s16 = smov 8  }
  0x12   :  { %27 = dma.hbm_to_vmem [thread:$0]  %s1624_s0, 256, %s22_s28, [#allocation3], %s1412_s15, %s1412_s15, %s1413_s16  }
  0x13   :  { %s1414_s19 = smov [#allocation5]   ;;  %s1361_s23 = scalar_lea.hbm %s1627_s3, 128 }
  0x14   :  { %s38_s20 = sshll.u32 %s1414_s19, 4  ;;  %p1362_p8 = scmp.ne.s32.totalorder %s1627_s3, %s1361_s23  ;;  %s39_s20 = int_to_ptr.vmem [resolvable:$true] %s38_s20 }
  0x15   :  { %p1365_p9 = scmp.lt.u32.totalorder %s1361_s23, %s1627_s3 }
  0x17   :  { %p1367_p10 = pnand %p1365_p9, %p1362_p8 }
  0x19   :  { %1370 = shalt.err (!%p1367_p10)
}
  0x1a   :  { %s1371_s29 = scalar_lea.vmem %s39_s20, 128  ;;  %p1376_p12 = scmp.lt.s32.totalorder %s39_s20, %s39_s20 }
  0x1b   :  { %p1372_p11 = scmp.ne.s32.totalorder %s39_s20, %s1371_s29  ;;  %p1377_p13 = scmp.lt.s32.totalorder %s1371_s29, %s1371_s29 }
  0x1d   :  { %p1378_p0 = por %p1377_p13, %p1376_p12 }
  0x1f   :  { %p1379_p1 = pnand %p1378_p0, %p1372_p11 }
  0x21   :  { %1382 = shalt.err (!%p1379_p1)
}
  0x22   :  { %41 = dma.hbm_to_vmem [thread:$0]  %s1627_s3, 128, %s39_s20, [#allocation6]  }
  0x23   :  { %1405 = dma.done.wait [#allocation3], 256  }
  0x24   :  { %1406 = vsyncadd [#allocation3], 4294967040 }
  0x25   :  { %1407 = dma.done.wait [#allocation6], 128  }
  0x26   :  { %1408 = vsyncadd [#allocation6], 4294967168  ;;  %vm67_vm0 = vcmask 64512   ;;  %v66_v0 = vld [vmem:[#allocation5] sm:$0xff]  ;;  %v64_v1 = vld [vmem:[%s1625_s1] sm:$0xff]  ;;  %s1415_s3 = smov 96  }
  0x27   :  { %v65_v2 = vld [vmem:[%s1625_s1 + $0x8] sm:$0xff]  ;;  %1105 = vmatprep.subr.mxu0 %v66_v0  ;;  %1107 = vmatprep.mubr.msk.f32.mxu0 %vm67_vm0, %v64_v1  ;;  %s1416_s12 = smov 64   ;;  %v1506_v9 = vld [vmem:[#allocation2] sm:$0xff]  ;;  %vm179_vm1 = vcmask 392192   ;;  %v267_v24 = vld [vmem:[%s1628_s4 + $0x10] sm:$0xff]  ;;  %vm269_vm2 = vcmask 261120  }
  0x28   :  { %1106 = vmatpush3.msra.mxu0 %v66_v0  ;;  %1122 = vmatprep.mubr.msk.f32.mxu1 %vm179_vm1, %v1506_v9  ;;  %v265_v12 = vld [vmem:[%s1628_s4] sm:$0xff]  ;;  %v266_v13 = vld [vmem:[%s1628_s4 + $0x8] sm:$0xff]  ;;  %v268_v25 = vld [vmem:[%s1628_s4 + $0x18] sm:$0xff]  ;;  %s1420_s30 = smov 28   ;;  %s1421_s9 = smov 29   ;;  %vm731_vm3 = vcmask 130048  }
  0x29   :  { %1108 = vmatmul.mubr.msk.f32.vlgmr.msra.gmra.mrb[0].mxu0 %vm67_vm0, %v65_v2  ;;  %v1207_v14 = vpack.c.bf16 %v266_v13, %v265_v12  ;;  %v1518_v23 = vld [vmem:[#allocation2 + $0x8] sm:$0xff]  ;;  %v1211_v26 = vpack.c.bf16 %v268_v25, %v267_v24  ;;  %v1042_v27 = vld [vmem:[%s1631_s7] ss:$0 sm:$0xff]  ;;  %v462_v55 = vld [vmem:[%s1629_s5 + $0x10] sm:$0xff]  ;;  %s1423_s10 = smov 16   ;;  %s1424_s11 = smov 32  }
  0x2a   :  { %v460_v44 = vld [vmem:[%s1629_s5] sm:$0xff]  ;;  %v461_v45 = vld [vmem:[%s1629_s5 + $0x8] sm:$0xff]  ;;  %v463_v56 = vld [vmem:[%s1629_s5 + $0x18] sm:$0xff]  ;;  %s1419_s5 = smov 27   ;;  %vm59_vm4 = vcmp.gt.f32.partialorder %v1518_v23, 0.0  ;;  %vm58_vm5 = vcmp.gt.f32.partialorder %v1506_v9, 0.0 }
  0x2b   :  { %1208 = vmatprep.subr.bf16.mxu0 %v1207_v14  ;;  %v1227_v46 = vpack.c.bf16 %v461_v45, %v460_v44  ;;  %v1231_v57 = vpack.c.bf16 %v463_v56, %v462_v55  ;;  %v1047_v58 = vld [vmem:[%s1631_s7 + $0x1] ss:$0 sm:$0xff]  ;;  %vm1426_vm8 = vmmov 0   ;;  %s1428_s22 = smov [#allocation7]   ;;  %vm1022_vm11 = vcmask 25600  }
  0x2c   :  { %1210 = vmatpush3.bf16.msra.mxu0 %v1207_v14  ;;  %s1030_s23 = sshll.u32 %s1428_s22, 4  ;;  %s1031_s23 = int_to_ptr.vmem [resolvable:$true] %s1030_s23 }
  0x2d   :  { %1212 = vmatprep.subr.bf16.mxu0 %v1211_v26  ;;  %p1388_p3 = scmp.lt.s32.totalorder %s1031_s23, %s1031_s23 }
  0x30   :  { %1214 = vmatpush3.bf16.msra.mxu0 %v1211_v26 }
  0xfc   :  { %v1109_v3 = vpop.f32.mrb[0].mxu0 }
  0xfd   :  { %v140_v4 = vpop.f32.mrb[1].mxu0  ;;  %v154_v28 = vadd.f32 %v1109_v3, %v1042_v27 }
  0xfe   :  { %v1279_v5 = vpack.i.bf16 %v1109_v3, %v140_v4  ;;  %v153_v30 = vadd.f32 %v1042_v27, %v140_v4  ;;  %v1417_v3 = vmov 98   ;;  %v1418_v4 = vmov 97  }
  0xff   :  { %1315 = vset.pattern.permute.xlu0 %v1417_v3  ;;  %1314 = vset.pattern.permute.xlu1 %v1418_v4 }
 0x100   :  { %1275 = vrot.lane.b32.xlu0 %v1279_v5, %s1415_s3 }
 0x104   :  { %1280 = vrot.lane.b32.xlu0 %v1279_v5, %s1416_s12 }
 0x172   :  { %v1276_v6 = vpop.permute.xlu0 %1275 }
 0x173   :  { %v1278_v7 = vunpack.i.h.bf16 %v1276_v6  ;;  %v1277_v8 = vunpack.i.l.bf16 %v1276_v6  ;;  %1285 = vrot.lane.b32.xlu1 %v1276_v6, %s1415_s3 }
 0x175   :  { %v1195_v10 = vpack.c.bf16 %v1278_v7, %v1277_v8 }
 0x176   :  { %v1281_v11 = vpop.permute.xlu0 %1280 }
 0x177   :  { %1196 = vmatprep.subr.bf16.mxu1 %v1195_v10  ;;  %1290 = vrot.lane.b32.xlu1 %v1281_v11, %s1415_s3 }
 0x178   :  { %1198 = vmatpush3.bf16.msra.mxu1 %v1195_v10  ;;  %v1422_v10 = vmov 96  }
 0x1e5   :  { %v1286_v15 = vpop.permute.xlu1 %1285 }
 0x1e6   :  { %v1288_v16 = vunpack.i.h.bf16 %v1286_v15  ;;  %v1287_v17 = vunpack.i.l.bf16 %v1286_v15 }
 0x1e8   :  { %v1199_v18 = vpack.c.bf16 %v1288_v16, %v1287_v17 }
 0x1e9   :  { %v1291_v19 = vpop.permute.xlu1 %1290 }
 0x1ea   :  { %v1293_v20 = vunpack.i.h.bf16 %v1291_v19  ;;  %v1292_v21 = vunpack.i.l.bf16 %v1291_v19  ;;  %1200 = vmatprep.subr.bf16.mxu1 %v1199_v18 }
 0x1eb   :  { %1202 = vmatpush3.bf16.msra.mxu1 %v1199_v18  ;;  %v605_v18 = vlaneseq }
 0x1ec   :  { %v1203_v22 = vpack.c.bf16 %v1293_v20, %v1292_v21 }
 0x1ed   :  { %v606_v21 = vshrl.u32 %v605_v18, 7 }
 0x1ee   :  { %1204 = vmatprep.subr.bf16.mxu1 %v1203_v22 }
 0x1ef   :  { %1206 = vmatpush3.bf16.msra.mxu1 %v1203_v22  ;;  %v607_v25 = vsub.s32 0, %v606_v21 }
 0x1f0   :  { %1228 = vmatprep.subr.bf16.mxu1 %v1227_v46 }
 0x1f2   :  { %1123 = vmatmul.mubr.msk.f32.vlgmr.msra.gmra.mrb[0].mxu1 %vm179_vm1, %v1518_v23 }
 0x1f3   :  { %1230 = vmatpush3.bf16.msra.mxu1 %v1227_v46 }
 0x1f4   :  { %1232 = vmatprep.subr.bf16.mxu1 %v1231_v57 }
 0x1f7   :  { %1234 = vmatpush3.bf16.msra.mxu1 %v1231_v57 }
 0x2c5   :  { %v1124_v29 = vpop.f32.mrb[0].mxu1 }
 0x2c6   :  { %v262_v31 = vadd.f32 %v1124_v29, %v154_v28  ;;  %v252_v32 = vpop.f32.mrb[1].mxu1 }
 0x2c7   :  { %v261_v33 = vadd.f32 %v252_v32, %v153_v30 }
 0x2c8   :  { %v264_v35 = vmax.f32 %v262_v31, 0.0 }
 0x2c9   :  { %v263_v34 = vmax.f32 %v261_v33, 0.0 }
 0x2cb   :  { %1133 = vmatprep.mubr.msk.f32.mxu0 %vm269_vm2, %v263_v34 }
 0x2cc   :  { %1134 = vmatmul.mubr.msk.f32.vlgmr.msra.gmra.mrb[2].mxu0 %vm269_vm2, %v264_v35 }
 0x2cd   :  { %1148 = vmatprep.mubr.msk.f32.mxu0 %vm179_vm1, %v1506_v9 }
 0x39f   :  { %v1135_v36 = vpop.f32.mrb[2].mxu0 }
 0x3a0   :  { %v342_v37 = vpop.f32.mrb[3].mxu0  ;;  %v356_v59 = vadd.f32 %v1135_v36, %v1047_v58 }
 0x3a1   :  { %v1299_v38 = vpack.i.bf16 %v1135_v36, %v342_v37  ;;  %v355_v61 = vadd.f32 %v1047_v58, %v342_v37 }
 0x3a3   :  { %1300 = vrot.lane.b32.xlu1 %v1299_v38, %s1416_s12  ;;  %1295 = vrot.lane.b32.xlu0 %v1299_v38, %s1415_s3 }
 0x415   :  { %v1301_v39 = vpop.permute.xlu1 %1300  ;;  %v1296_v40 = vpop.permute.xlu0 %1295 }
 0x416   :  { %v1298_v41 = vunpack.i.h.bf16 %v1296_v40  ;;  %v1297_v42 = vunpack.i.l.bf16 %v1296_v40  ;;  %1310 = vrot.lane.b32.xlu1 %v1301_v39, %s1415_s3  ;;  %1305 = vrot.lane.b32.xlu0 %v1296_v40, %s1415_s3 }
 0x418   :  { %v1215_v43 = vpack.c.bf16 %v1298_v41, %v1297_v42 }
 0x41a   :  { %1216 = vmatprep.subr.bf16.mxu0 %v1215_v43 }
 0x41b   :  { %1218 = vmatpush3.bf16.msra.mxu0 %v1215_v43 }
 0x488   :  { %v1311_v47 = vpop.permute.xlu1 %1310  ;;  %v1306_v48 = vpop.permute.xlu0 %1305 }
 0x489   :  { %v1313_v49 = vunpack.i.h.bf16 %v1311_v47  ;;  %v1312_v50 = vunpack.i.l.bf16 %v1311_v47  ;;  %v1308_v51 = vunpack.i.h.bf16 %v1306_v48  ;;  %v1307_v52 = vunpack.i.l.bf16 %v1306_v48 }
 0x48b   :  { %v1219_v53 = vpack.c.bf16 %v1308_v51, %v1307_v52  ;;  %v1223_v54 = vpack.c.bf16 %v1313_v49, %v1312_v50 }
 0x48d   :  { %1220 = vmatprep.subr.bf16.mxu0 %v1219_v53 }
 0x48e   :  { %1222 = vmatpush3.bf16.msra.mxu0 %v1219_v53 }
 0x48f   :  { %1224 = vmatprep.subr.bf16.mxu0 %v1223_v54 }
 0x492   :  { %1226 = vmatpush3.bf16.msra.mxu0 %v1223_v54 }
 0x495   :  { %1149 = vmatmul.mubr.msk.f32.vlgmr.msra.gmra.mrb[4].mxu0 %vm179_vm1, %v1518_v23 }
 0x568   :  { %v1150_v60 = vpop.f32.mrb[4].mxu0 }
 0x569   :  { %v457_v62 = vadd.f32 %v1150_v60, %v356_v59  ;;  %v447_v63 = vpop.f32.mrb[5].mxu0 }
 0x56a   :  { %v456_v0 = vadd.f32 %v447_v63, %v355_v61 }
 0x56b   :  { %v459_v2 = vmax.f32 %v457_v62, 0.0 }
 0x56c   :  { %v458_v1 = vmax.f32 %v456_v0, 0.0 }
 0x56e   :  { %1159 = vmatprep.mubr.msk.f32.mxu1 %vm269_vm2, %v458_v1 }
 0x56f   :  { %1160 = vmatmul.mubr.msk.f32.vlgmr.msra.gmra.mrb[2].mxu1 %vm269_vm2, %v459_v2 }
 0x642   :  { %v1161_v5 = vpop.f32.mrb[2].mxu1 }
 0x643   :  { %665 = vrot.lane.b32.xlu1 %v1161_v5, %s1419_s5  ;;  %613 = vrot.lane.b32.xlu0 %v1161_v5, %s1420_s30  ;;  %v536_v6 = vpop.f32.mrb[3].mxu1 }
 0x644   :  { %v1235_v7 = vpack.c.bf16 %v1161_v5, %v536_v6  ;;  %v1559_v8 = vpack.i.bf16 %v1161_v5, %v536_v6 }
 0x646   :  { %1236 = vmatprep.subr.bf16.mxu1 %v1235_v7 }
 0x647   :  { %663 = vrot.lane.b32.xlu1 %v536_v6, %s1419_s5  ;;  %611 = vrot.lane.b32.xlu0 %v536_v6, %s1420_s30 }
 0x648   :  { %1238 = vmatpush3.bf16.msra.mxu1 %v1235_v7 }
 0x64b   :  { %654 = vperm.xlu1 %1314, %v1161_v5   ;;  %706 = vperm.xlu0 %1315, %v1161_v5  }
 0x64f   :  { %561 = vrot.lane.b32.xlu1 %v1161_v5, %s1421_s9  ;;  %1316 = vset.pattern.permute.xlu0 %v1418_v4 }
 0x650   :  { %650 = vperm.xlu0 %1316, %v536_v6   ;;  %1317 = vset.pattern.permute.xlu1 %v1417_v3 }
 0x653   :  { %702 = vperm.xlu1 %1317, %v536_v6  }
 0x654   :  { %1318 = vset.pattern.permute.xlu0 %v1422_v10 }
 0x655   :  { %598 = vperm.xlu0 %1318, %v536_v6  }
 0x657   :  { %559 = vrot.lane.b32.xlu1 %v536_v6, %s1421_s9 }
 0x6b5   :  { %v666_v11 = vpop.permute.xlu1 %665  ;;  %v614_v12 = vpop.permute.xlu0 %613 }
 0x6b9   :  { %v664_v13 = vpop.permute.xlu1 %663  ;;  %v612_v14 = vpop.permute.xlu0 %611 }
 0x6ba   :  { %669 = vxpose.xlu1.b32.start [1/2] (short) (narrow) %v664_v13, 8  ;;  %617 = vxpose.xlu0.b32.start [1/2] (short) (narrow) %v612_v14, 8  ;;  %v1427_v13 = vmov 0.0  }
 0x6bb   :  { %1181 = vmatprep.mubr.msk.f32.mxu0 %vm1426_vm8, %v1427_v13 }
 0x6be   :  { %670 = vxpose.xlu1.b32.end [2/2] (short) (narrow) %v666_v11, 8  ;;  %618 = vxpose.xlu0.b32.end [2/2] (short) (narrow) %v614_v12, 8  ;;  %v1425_v12 = vmov 0.0|0.0  }
 0x6bf   :  { %1247 = vmatprep.subr.bf16.mxu0 %v1425_v12 }
 0x6ca   :  { %v655_v15 = vpop.permute.xlu1 %654  ;;  %v707_v16 = vpop.permute.xlu0 %706 }
 0x6ce   :  { %v562_v17 = vpop.permute.xlu1 %561 }
 0x6cf   :  { %v651_v19 = vpop.permute.xlu0 %650 }
 0x6d2   :  { %v703_v20 = vpop.permute.xlu1 %702 }
 0x6d4   :  { %v599_v22 = vpop.permute.xlu0 %598 }
 0x6d6   :  { %v560_v24 = vpop.permute.xlu1 %559 }
 0x6dc   :  { %1319 = vset.pattern.permute.xlu1 %v1422_v10 }
 0x6dd   :  { %602 = vperm.xlu1 %1319, %v1161_v5  }
 0x73a   :  { %v685_v26 = vpop.trf.xlu1  ;;  %v633_v27 = vpop.trf.xlu0 }
 0x73b   :  { %v660_v28 = vrot.slane %v633_v27, %v607_v25  ;;  %v712_v29 = vrot.slane %v685_v26, %v607_v25 }
 0x73d   :  { %v661_v30 = vadd.f32 %v660_v28, %v651_v19  ;;  %v662_v31 = vadd.f32 %v660_v28, %v655_v15  ;;  %v713_v32 = vadd.f32 %v712_v29, %v703_v20  ;;  %v714_v33 = vadd.f32 %v712_v29, %v707_v16  ;;  %v1054_v19 = vld [vmem:[%s1631_s7 + $0x2] ss:$0 sm:$0xff] }
 0x73f   :  { %719 = vrot.lane.b32.xlu1 %v662_v31, %s1423_s10  ;;  %717 = vrot.lane.b32.xlu0 %v661_v30, %s1423_s10  ;;  %v941_v30 = vld [vmem:[%s1630_s6] sm:$0xff]  ;;  %v942_v31 = vld [vmem:[%s1630_s6 + $0x8] sm:$0xff] }
 0x743   :  { %727 = vrot.lane.b32.xlu1 %v714_v33, %s1424_s11  ;;  %725 = vrot.lane.b32.xlu0 %v713_v32, %s1424_s11  ;;  %v867_v33 = vld [vmem:[%s1626_s2] sm:$0x3] }
 0x75c   :  { %v603_v35 = vpop.permute.xlu1 %602 }
 0x761   :  { %565 = vxpose.xlu0.b32.start [1/2] (short) (narrow) %v560_v24, 8 }
 0x765   :  { %566 = vxpose.xlu0.b32.end [2/2] (short) (narrow) %v562_v17, 8 }
 0x78e   :  { %1330 = vset.pattern.permute.xlu0 %v1417_v3 }
 0x7b1   :  { %v718_v34 = vpop.permute.xlu0 %717  ;;  %v720_v37 = vpop.permute.xlu1 %719 }
 0x7b5   :  { %v726_v36 = vpop.permute.xlu0 %725  ;;  %v728_v42 = vpop.permute.xlu1 %727 }
 0x7e1   :  { %v581_v38 = vpop.trf.xlu0 }
 0x7e2   :  { %v608_v39 = vrot.slane %v581_v38, %v607_v25 }
 0x7e4   :  { %v609_v40 = vadd.f32 %v608_v39, %v599_v22  ;;  %v610_v41 = vadd.f32 %v608_v39, %v603_v35  ;;  %v943_v35 = vld [vmem:[%s1630_s6 + $0x10] sm:$0xff] }
 0x7e6   :  { %v733_v43 = vsel %vm731_vm3, %v610_v41, %v720_v37  ;;  %v732_v44 = vsel %vm731_vm3, %v609_v40, %v718_v34  ;;  %v1251_v34 = vpack.c.bf16 %v942_v31, %v941_v30  ;;  %v1056_v40 = vld [vmem:[%s1631_s7 + $0x3] ss:$0 sm:$0xff] }
 0x7e7   :  { %v735_v45 = vsel %vm269_vm2, %v733_v43, %v728_v42  ;;  %v734_v46 = vsel %vm269_vm2, %v732_v44, %v726_v36  ;;  %v944_v36 = vld [vmem:[%s1630_s6 + $0x18] sm:$0xff]  ;;  %s1383_s6 = scalar_lea.vmem %s1031_s23, 32 }
 0x7e8   :  { %vm737_vm6 = vcmp.gt.f32.partialorder %v735_v45, 0.0  ;;  %v739_v47 = vmul.f32 0.2, %v735_v45  ;;  %vm736_vm7 = vcmp.gt.f32.partialorder %v734_v46, 0.0  ;;  %v738_v48 = vmul.f32 0.2, %v734_v46  ;;  %p1384_p2 = scmp.ne.s32.totalorder %s1031_s23, %s1383_s6  ;;  %p1389_p4 = scmp.lt.s32.totalorder %s1383_s6, %s1383_s6 }
 0x7e9   :  { %v1254_v37 = vpack.c.bf16 %v944_v36, %v943_v35 }
 0x7ea   :  { %v741_v49 = vsel %vm737_vm6, %v735_v45, %v739_v47  ;;  %v740_v50 = vsel %vm736_vm7, %v734_v46, %v738_v48  ;;  %p1390_p5 = por %p1389_p4, %p1388_p3 }
 0x7eb   :  { %v743_v51 = vsel %vm59_vm4, %v741_v49, -1e+30  ;;  %v742_v52 = vsel %vm58_vm5, %v740_v50, -1e+30 }
 0x7ec   :  { %v747_v53 = vsel %vm179_vm1, %v743_v51, -inf  ;;  %v744_v54 = vsel %vm179_vm1, %v742_v52, -inf  ;;  %p1391_p6 = pnand %p1390_p5, %p1384_p2 }
 0x7ed   :  { %748 = vmax.xlane.f32.xlu0 %v747_v53  ;;  %745 = vmax.xlane.f32.xlu1 %v744_v54 }
 0x7fe   :  { %1321 = vrot.lane.b32.xlu1 %v1559_v8, %s1415_s3 }
 0x802   :  { %1326 = vrot.lane.b32.xlu1 %v1559_v8, %s1416_s12 }
 0x87a   :  { %v749_v55 = vpop.xlane.xlu0 %748  ;;  %v746_v56 = vpop.xlane.xlu1 %745 }
 0x87b   :  { %v751_v57 = vsub.f32 %v743_v51, %v749_v55  ;;  %v750_v58 = vsub.f32 %v742_v52, %v746_v56 }
 0x87d   :  { %v754_v59 = vmul.f32 1.442695, %v751_v57  ;;  %v752_v60 = vmul.f32 1.442695, %v750_v58 }
 0x87e   :  { %v1322_v61 = vpop.permute.xlu1 %1321 }
 0x87f   :  { %1331 = vpow2.f32 %v754_v59  ;;  %v1324_v62 = vunpack.i.h.bf16 %v1322_v61  ;;  %v1323_v63 = vunpack.i.l.bf16 %v1322_v61 }
 0x880   :  { %1333 = vpow2.f32 %v752_v60 }
 0x881   :  { %v1239_v0 = vpack.c.bf16 %v1324_v62, %v1323_v63 }
 0x882   :  { %v1327_v1 = vpop.permute.xlu1 %1326 }
 0x883   :  { %v1329_v2 = vunpack.i.h.bf16 %v1327_v1  ;;  %v1328_v3 = vunpack.i.l.bf16 %v1327_v1  ;;  %1240 = vmatprep.subr.bf16.mxu1 %v1239_v0 }
 0x884   :  { %1242 = vmatpush3.bf16.msra.mxu1 %v1239_v0 }
 0x885   :  { %v1243_v4 = vpack.c.bf16 %v1329_v2, %v1328_v3 }
 0x887   :  { %1244 = vmatprep.subr.bf16.mxu1 %v1243_v4 }
 0x888   :  { %1246 = vmatpush3.bf16.msra.mxu1 %v1243_v4 }
 0x889   :  { %v1332_v5 = vpop.eup %1331 }
 0x88a   :  { %v1334_v6 = vpop.eup %1333  ;;  %v757_v7 = vsel %vm59_vm4, %v1332_v5, 0.0 }
 0x88b   :  { %v756_v8 = vsel %vm58_vm5, %v1334_v6, 0.0  ;;  %v761_v10 = vsel %vm179_vm1, %v757_v7, 0.0 }
 0x88c   :  { %1174 = vmatprep.mubr.msk.f32.mxu1 %vm179_vm1, %v756_v8  ;;  %762 = vadd.xlane.f32.xlu0 %v761_v10  ;;  %v758_v11 = vsel %vm179_vm1, %v756_v8, 0.0 }
 0x88d   :  { %759 = vadd.xlane.f32.xlu1 %v758_v11  ;;  %1175 = vmatmul.mubr.msk.f32.vlgmr.msra.gmra.mrb[4].mxu1 %vm179_vm1, %v757_v7 }
 0x919   :  { %v763_v23 = vpop.xlane.xlu0 %762 }
 0x91a   :  { %v760_v14 = vpop.xlane.xlu1 %759  ;;  %v846_v9 = vmax.f32 %v763_v23, 1e-30  ;;  %vm850_vm9 = vcmp.gt.f32.partialorder %v763_v23, 0.0 }
 0x91b   :  { %v845_v15 = vmax.f32 %v760_v14, 1e-30  ;;  %vm849_vm10 = vcmp.gt.f32.partialorder %v760_v14, 0.0 }
 0x91c   :  { %1335 = vrcp.f32 %v846_v9 }
 0x91d   :  { %1337 = vrcp.f32 %v845_v15 }
 0x926   :  { %v1336_v16 = vpop.eup %1335 }
 0x927   :  { %v1338_v18 = vpop.eup %1337 }
 0x960   :  { %v1176_v17 = vpop.f32.mrb[4].mxu1 }
 0x961   :  { %v852_v20 = vmul.f32 %v1336_v16, %v1176_v17  ;;  %v836_v21 = vpop.f32.mrb[5].mxu1 }
 0x962   :  { %v851_v22 = vmul.f32 %v1338_v18, %v836_v21 }
 0x963   :  { %v858_v24 = vsel %vm850_vm9, %v852_v20, 0.0 }
 0x964   :  { %v864_v25 = vadd.f32 %v1054_v19, %v858_v24  ;;  %v857_v26 = vsel %vm849_vm10, %v851_v22, 0.0 }
 0x965   :  { %v863_v27 = vadd.f32 %v1054_v19, %v857_v26 }
 0x966   :  { %v866_v28 = vmax.f32 %v864_v25, 0.0 }
 0x967   :  { %v865_v29 = vmax.f32 %v863_v27, 0.0 }
 0x969   :  { %v1248_v32 = vpack.c.bf16 %v866_v28, %v865_v29 }
 0x96b   :  { %1249 = vmatpush3.bf16.msra.mxu0 %v1248_v32 }
 0x96c   :  { %1250 = vmatprep.subr.bf16.mxu0 %v1425_v12 }
 0x96e   :  { %1182 = vmatmul.mubr.msk.f32.vlgmr.msra.gmra.mrb[6].mxu0 %vm731_vm3, %v867_v33 }
 0x96f   :  { %1252 = vmatpush3.bf16.msra.mxu0 %v1251_v34  ;;  %1192 = vmatprep.mubr.msk.f32.mxu0 %vm1426_vm8, %v1427_v13 }
 0x970   :  { %1253 = vmatprep.subr.bf16.mxu0 %v1425_v12 }
 0x973   :  { %1255 = vmatpush3.bf16.msra.mxu0 %v1254_v37 }
 0xa41   :  { %v937_v38 = vpop.f32.mrb[6].mxu0 }
 0xa42   :  { %v1183_v39 = vpop.f32.mrb[7].mxu0  ;;  %1193 = vmatmul.mubr.msk.f32.vlgmr.msra.gmra.mrb[8].mxu0 %vm269_vm2, %v937_v38 }
 0xb15   :  { %v1018_v41 = vpop.f32.mrb[8].mxu0 }
 0xb16   :  { %v1019_v42 = vadd.f32 %v1056_v40, %v1018_v41  ;;  %v1194_v43 = vpop.f32.mrb[9].mxu0 }
 0xb18   :  { %1023 = vst.msk [vmem:[#allocation7] sm:$0x3] %vm1022_vm11, %v1019_v42 }
 0xb19   :  { %1394 = shalt.err (!%p1391_p6)
}
 0xb1a   :  { %s1395_s26 = scalar_lea.hbm %s1632_s8, 32 }
 0xb1b   :  { %p1396_p7 = scmp.ne.s32.totalorder %s1632_s8, %s1395_s26  ;;  %p1399_p8 = scmp.lt.u32.totalorder %s1395_s26, %s1632_s8 }
 0xb1d   :  { %p1401_p9 = pnand %p1399_p8, %p1396_p7 }
 0xb1f   :  { %1404 = shalt.err (!%p1401_p9)
}
 0xb20   :  { %1033 = dma.vmem_to_hbm [thread:$0]  %s1031_s23, 32, %s1632_s8, [#allocation4]  }
 0xb21   :  { %1409 = dma.done.wait [#allocation4], 32  }
 0xb22   :  { %1410 = vsyncadd [#allocation4], 4294967264 }
 0xb23   :  { %1037 = vsyncpa [#allocation3], 1 }
 0xb24   :  { %1038 = vsyncpa [#allocation6], 1 }
 0xb25   :  { %1039 = vsyncpa [#allocation4], 1 }

</bundles_post_ra>
